<compile_context>
chip_gen: v7x
topology: tpu7x:2x2x1
jax: 0.10.0
libtpu: 0.0.40
codegen_flags: <defaults>
</compile_context>

<pallas_src>
import jax
import jax.numpy as jnp
import numpy as np
from jax.experimental import pallas as pl
from jax.experimental.pallas import tpu as pltpu

NEG_INF = -1e30
LANE = 128


def _round_up(x, m):
    return ((x + m - 1) // m) * m


def _vmem_limit_bytes():
    """~75% of per-core VMEM, capped at 100 MiB; 48 MiB fallback."""
    default = 48 * 1024 * 1024
    try:
        cap = int(pltpu.get_tpu_info().vmem_capacity_bytes)
    except Exception:
        return default
    return max(default, min(cap * 3 // 4, 100 * 1024 * 1024))


# ---------------- Kernel A: projection + attention scalars ------------------
def _project_kernel(x_ref, w_ref, adst_ref, asrc_ref, h_ref, d_ref, s_ref):
    # bf16 MXU operands, f32 accumulation.
    h = jnp.dot(x_ref[...].astype(jnp.bfloat16), w_ref[...],
                preferred_element_type=jnp.float32)                   # (TM, Dp) f32
    h_ref[...] = h.astype(jnp.bfloat16)                               # stored once, bf16
    # Attention scalars on VPU + lane reduce (no degenerate (D,1) MXU ops).
    d_ref[...] = jnp.sum(h * adst_ref[...], axis=-1, keepdims=True)   # (TM, 1) f32
    s_ref[...] = jnp.sum(h * asrc_ref[...], axis=-1, keepdims=True)   # (TM, 1) f32


def _gat_project(x, w, a_dst_row, a_src_row, *, tm, vmem_limit):
    n, f = x.shape
    dp = w.shape[1]
    return pl.pallas_call(
        _project_kernel,
        grid=(n // tm,),
        in_specs=[
            pl.BlockSpec((tm, f), lambda i: (i, 0)),
            pl.BlockSpec((f, dp), lambda i: (0, 0)),    # weights stay resident (bf16)
            pl.BlockSpec((1, dp), lambda i: (0, 0)),
            pl.BlockSpec((1, dp), lambda i: (0, 0)),
        ],
        out_specs=(
            pl.BlockSpec((tm, dp), lambda i: (i, 0)),
            pl.BlockSpec((tm, 1), lambda i: (i, 0)),
            pl.BlockSpec((tm, 1), lambda i: (i, 0)),
        ),
        out_shape=(
            jax.ShapeDtypeStruct((n, dp), jnp.bfloat16),   # h emitted in bf16
            jax.ShapeDtypeStruct((n, 1), jnp.float32),
            jax.ShapeDtypeStruct((n, 1), jnp.float32),
        ),
        compiler_params=pltpu.CompilerParams(
            dimension_semantics=("parallel",),
            vmem_limit_bytes=vmem_limit,
        ),
    )(x, w, a_dst_row, a_src_row)


# ---------------- Kernel B: masked softmax + aggregation + ReLU -------------
def _gat_agg_kernel(d_ref, s_ref, h_ref, adj_ref, b_ref, o_ref):
    # e[i, j] = LeakyReLU(att_dst.h_i + att_src.h_j), slope 0.2 (PyG default).
    e = d_ref[...] + s_ref[...]                        # (TM,1)+(1,Gp) -> (TM,Gp) f32
    e = jnp.where(e > 0, e, 0.2 * e)
    e = jnp.where(adj_ref[...] != 0, e, NEG_INF)       # mask non-edges (int8 adj)
    # Softmax statistics in f32.
    m = jnp.max(e, axis=-1, keepdims=True)
    p = jnp.exp(e - m)
    denom = jnp.sum(p, axis=-1, keepdims=True)
    # bf16 MXU aggregation with f32 accumulation; h already bf16, no cast needed.
    agg = jnp.dot(p.astype(jnp.bfloat16), h_ref[...],
                  preferred_element_type=jnp.float32)
    out = agg * pl.reciprocal(denom, approx=True) + b_ref[...]
    o_ref[...] = jnp.maximum(out, 0.0)                 # fused ReLU, lane-dense store


def _gat_aggregate(d, s_row, h, adj, bias, *, tm, vmem_limit):
    b, gp, dp = h.shape
    return pl.pallas_call(
        _gat_agg_kernel,
        grid=(b, gp // tm),                                    # (sample, row block)
        in_specs=[
            pl.BlockSpec((None, tm, 1), lambda bi, i: (bi, i, 0)),   # d rows
            pl.BlockSpec((None, 1, gp), lambda bi, i: (bi, 0, 0)),   # s for this sample
            pl.BlockSpec((None, gp, dp), lambda bi, i: (bi, 0, 0)),  # h for this sample (bf16)
            pl.BlockSpec((None, tm, gp), lambda bi, i: (bi, i, 0)),  # int8 adjacency rows
            pl.BlockSpec((1, dp), lambda bi, i: (0, 0)),             # bias resident
        ],
        out_specs=pl.BlockSpec((None, tm, dp), lambda bi, i: (bi, i, 0)),
        out_shape=jax.ShapeDtypeStruct((b, gp, dp), jnp.float32),
        compiler_params=pltpu.CompilerParams(
            dimension_semantics=("parallel", "parallel"),
            vmem_limit_bytes=vmem_limit,
        ),
    )(d, s_row, h, adj, bias)


# ---------------- glue -------------------------------------------------------
def edge_index_to_batched_adj(edge_index, batch, g, gp):
    """adj[b, i, j] = 1 iff edge (b*g + j) -> (b*g + i) exists; + self loops.

    Assumes PyG-style batching: every edge stays inside its own sample."""
    src = edge_index[0].astype(jnp.int32)
    dst = edge_index[1].astype(jnp.int32)
    b = dst // g
    dl = dst - b * g
    sl = src - b * g
    adj = jnp.zeros((batch, gp, gp), jnp.int8)
    adj = adj.at[b, dl, sl].set(1)
    adj = jnp.maximum(adj, jnp.eye(gp, dtype=jnp.int8)[None, :, :])
    return adj


class CellEncoderPallas:
    """Pallas equivalent of Model/CellEncoder.CellEncoder (forward only)."""

    def __init__(self, num_feature, num_genes, layer_cell, dim_cell, key,
                 row_tile=256):
        assert row_tile % 32 == 0, "row_tile must be a multiple of 32"
        self.num_feature = num_feature
        self.final_node = num_genes
        self.layer_cell = layer_cell
        self.dim_cell = dim_cell
        self.row_tile = row_tile
        self.dp = _round_up(dim_cell, LANE)          # lane-dense hidden width
        self.params = []
        for i in range(layer_cell):
            f_in = num_feature if i == 0 else dim_cell
            f_in_p = num_feature if i == 0 else self.dp   # layer 0 NOT padded to 128
            key, k_w, k_s, k_d = jax.random.split(key, 4)
            # deterministic glorot-ish init (synthetic weights, no checkpoint)
            w = jax.random.normal(k_w, (f_in, dim_cell), jnp.float32) / np.sqrt(f_in)
            att_src = 0.1 * jax.random.normal(k_s, (1, dim_cell), jnp.float32)
            att_dst = 0.1 * jax.random.normal(k_d, (1, dim_cell), jnp.float32)
            # zero-pad to lane-dense shapes; padded rows/cols stay exactly zero
            wp = (jnp.zeros((f_in_p, self.dp), jnp.float32)
                  .at[:f_in, :dim_cell].set(w).astype(jnp.bfloat16))   # bf16 weights
            a_src = jnp.zeros((1, self.dp), jnp.float32).at[:, :dim_cell].set(att_src)
            a_dst = jnp.zeros((1, self.dp), jnp.float32).at[:, :dim_cell].set(att_dst)
            bias = jnp.zeros((1, self.dp), jnp.float32)
            self.params.append((wp, a_src, a_dst, bias))

    def _prepare(self, x, edge_index):
        n = x.shape[0]
        g = self.final_node
        assert n % g == 0, "node count must be batch * num_genes"
        batch = n // g
        tm = min(self.row_tile, _round_up(g, 32))
        gp = _round_up(g, tm)                      # per-sample padded gene count
        xb = jnp.zeros((batch, gp, self.num_feature), jnp.float32)
        xb = xb.at[:, :g, :].set(x.reshape(batch, g, self.num_feature))
        adj = edge_index_to_batched_adj(edge_index, batch, g, gp)
        return xb, adj, batch, g, gp, tm

    def __call__(self, x, edge_index):
        xb, adj, batch, g, gp, tm = self._prepare(x, edge_index)
        vmem = _vmem_limit_bytes()
        h = xb                                      # (B, Gp, F) f32
        for (wp, a_src, a_dst, bias) in self.params:
            flat = h.reshape(batch * gp, h.shape[-1])
            hp, d, s = _gat_project(flat, wp, a_dst, a_src, tm=tm, vmem_limit=vmem)
            hp = hp.reshape(batch, gp, self.dp)     # bf16
            d = d.reshape(batch, gp, 1)
            s_row = s.reshape(batch, 1, gp)         # contiguous -> pure reshape
            h = _gat_aggregate(d, s_row, hp, adj, bias, tm=tm, vmem_limit=vmem)
        out = h[:, :g, :self.dim_cell]
        # cell.x.reshape(-1, final_node * dim_cell)
        return out.reshape(-1, self.final_node * self.dim_cell)

    def reference(self, x, edge_index):
        """Pure-JAX reference of the same forward pass (for correctness check)."""
        xb, adj, batch, g, gp, tm = self._prepare(x, edge_index)
        h = xb
        for (wp, a_src, a_dst, bias) in self.params:
            w32 = wp.astype(jnp.float32)
            hh = jnp.einsum("bgf,fd->bgd", h, w32)
            d = jnp.sum(hh * a_dst, axis=-1, keepdims=True)
            s = jnp.sum(hh * a_src, axis=-1, keepdims=True)
            e = d + jnp.swapaxes(s, 1, 2)
            e = jnp.where(e > 0, e, 0.2 * e)
            e = jnp.where(adj != 0, e, NEG_INF)
            p = jax.nn.softmax(e, axis=-1)
            h = jnp.maximum(jnp.einsum("bij,bjd->bid", p, hh) + bias, 0.0)
        out = h[:, :g, :self.dim_cell]
        return out.reshape(-1, self.final_node * self.dim_cell)


def _build_edge_index(batch, num_genes):
    """Deterministic batched graph: ring (both directions) within each sample."""
    src, dst = [], []
    for b in range(batch):
        base = b * num_genes
        for gidx in range(num_genes):
            a = base + gidx
            c = base + (gidx + 1) % num_genes
            src += [a, c]
            dst += [c, a]
    return jnp.asarray(np.stack([src, dst]), dtype=jnp.int32)


if __name__ == "__main__":
    batch = 2
    num_genes = 32
    num_feature = 8
    dim_cell = 32
    layer_cell = 2

    key = jax.random.PRNGKey(0)
    key, k_x, k_p = jax.random.split(key, 3)

    n_nodes = batch * num_genes                  # cell.x holds batched nodes
    x = jax.random.normal(k_x, (n_nodes, num_feature), jnp.float32)
    edge_index = _build_edge_index(batch, num_genes)

    # small row_tile to exercise the (sample, row_block) grid at demo sizes
    encoder = CellEncoderPallas(num_feature, num_genes, layer_cell, dim_cell, k_p,
                                row_tile=32)
    out = jax.block_until_ready(encoder(x, edge_index))

    assert out.shape == (batch, num_genes * dim_cell), out.shape
    assert bool(jnp.all(jnp.isfinite(out)))
    assert bool(jnp.all(out >= 0.0))             # final ReLU

    # correctness vs pure-JAX reference (tolerance covers bf16 MXU operands and
    # the approximate reciprocal used for the softmax normalization)
    ref = jax.block_until_ready(encoder.reference(x, edge_index))
    np.testing.assert_allclose(np.asarray(out), np.asarray(ref),
                               rtol=5e-2, atol=5e-2)

    print("KERNEL_OK")
</pallas_src>

<mosaic_0001>
module attributes {stable_mosaic.version = 11 : i64} {
  func.func @_project_kernel(%arg0: i32, %arg1: memref<32x8xf32, #tpu.memory_space<vmem>>, %arg2: memref<8x128xbf16, #tpu.memory_space<vmem>>, %arg3: memref<1x128xf32, #tpu.memory_space<vmem>>, %arg4: memref<1x128xf32, #tpu.memory_space<vmem>>, %arg5: memref<32x128xbf16, #tpu.memory_space<vmem>>, %arg6: memref<32x1xf32, #tpu.memory_space<vmem>>, %arg7: memref<32x1xf32, #tpu.memory_space<vmem>>) attributes {dimension_semantics = [#tpu.dimension_semantics<parallel>], iteration_bounds = array<i64: 2>, scalar_prefetch = 0 : i64, scratch_operands = 0 : i64, tpu.core_type = #tpu.core_type<tc>, window_params = [{transform_indices = @transform_0, window_bounds = array<i64: 32, 8>}, {pipeline_mode = #tpu.pipeline_mode<synchronous>, transform_indices = @transform_1, window_bounds = array<i64: 8, 128>}, {pipeline_mode = #tpu.pipeline_mode<synchronous>, transform_indices = @transform_2, window_bounds = array<i64: 1, 128>}, {pipeline_mode = #tpu.pipeline_mode<synchronous>, transform_indices = @transform_3, window_bounds = array<i64: 1, 128>}, {transform_indices = @transform_4, window_bounds = array<i64: 32, 128>}, {transform_indices = @transform_5, window_bounds = array<i64: 32, 1>}, {transform_indices = @transform_6, window_bounds = array<i64: 32, 1>}]} {
    %c0 = arith.constant 0 : index
    %c0_0 = arith.constant 0 : index
    %0 = vector.load %arg1[%c0, %c0_0] : memref<32x8xf32, #tpu.memory_space<vmem>>, vector<32x8xf32>
    %1 = arith.truncf %0 : vector<32x8xf32> to vector<32x8xbf16>
    %c0_1 = arith.constant 0 : index
    %c0_2 = arith.constant 0 : index
    %2 = vector.load %arg2[%c0_1, %c0_2] : memref<8x128xbf16, #tpu.memory_space<vmem>>, vector<8x128xbf16>
    %cst = arith.constant dense<0.000000e+00> : vector<32x128xf32>
    %3 = tpu.matmul %1, %2, %cst {dimension_numbers = #tpu.dot_dimension_numbers<[1], [0], [0], [1], [0, 0, 1, 1], [], []>} : vector<32x8xbf16>, vector<8x128xbf16>, vector<32x128xf32> -> vector<32x128xf32>
    %4 = arith.truncf %3 : vector<32x128xf32> to vector<32x128xbf16>
    %c0_3 = arith.constant 0 : index
    %c0_4 = arith.constant 0 : index
    %5 = vector.load %arg5[%c0_3, %c0_4] : memref<32x128xbf16, #tpu.memory_space<vmem>>, vector<32x128xbf16>
    tpu.vector_store %arg5[%c0_3, %c0_4], %4 {strides = array<i32>} : memref<32x128xbf16, #tpu.memory_space<vmem>>, vector<32x128xbf16>,
    %c0_5 = arith.constant 0 : index
    %c0_6 = arith.constant 0 : index
    %6 = vector.load %arg3[%c0_5, %c0_6] : memref<1x128xf32, #tpu.memory_space<vmem>>, vector<1x128xf32>
    %7 = vector.broadcast %6 : vector<1x128xf32> to vector<32x128xf32>
    %8 = arith.mulf %3, %7 : vector<32x128xf32>
    %cst_7 = arith.constant dense<0.000000e+00> : vector<32xf32>
    %9 = vector.multi_reduction <add>, %8, %cst_7 [1] : vector<32x128xf32> to vector<32xf32>
    %10 = vector.shape_cast %9 : vector<32xf32> to vector<32x1xf32>
    %c0_8 = arith.constant 0 : index
    %c0_9 = arith.constant 0 : index
    %11 = vector.load %arg6[%c0_8, %c0_9] : memref<32x1xf32, #tpu.memory_space<vmem>>, vector<32x1xf32>
    tpu.vector_store %arg6[%c0_8, %c0_9], %10 {strides = array<i32>} : memref<32x1xf32, #tpu.memory_space<vmem>>, vector<32x1xf32>,
    %c0_10 = arith.constant 0 : index
    %c0_11 = arith.constant 0 : index
    %12 = vector.load %arg4[%c0_10, %c0_11] : memref<1x128xf32, #tpu.memory_space<vmem>>, vector<1x128xf32>
    %13 = vector.broadcast %12 : vector<1x128xf32> to vector<32x128xf32>
    %14 = arith.mulf %3, %13 : vector<32x128xf32>
    %cst_12 = arith.constant dense<0.000000e+00> : vector<32xf32>
    %15 = vector.multi_reduction <add>, %14, %cst_12 [1] : vector<32x128xf32> to vector<32xf32>
    %16 = vector.shape_cast %15 : vector<32xf32> to vector<32x1xf32>
    %c0_13 = arith.constant 0 : index
    %c0_14 = arith.constant 0 : index
    %17 = vector.load %arg7[%c0_13, %c0_14] : memref<32x1xf32, #tpu.memory_space<vmem>>, vector<32x1xf32>
    tpu.vector_store %arg7[%c0_13, %c0_14], %16 {strides = array<i32>} : memref<32x1xf32, #tpu.memory_space<vmem>>, vector<32x1xf32>,
    return
  }
  func.func @transform_0(%arg0: i32) -> (i32, i32) {
    %c0_i32 = arith.constant 0 : i32
    %c0_i32_0 = arith.constant 0 : i32
    return %arg0, %c0_i32 : i32, i32
  }
  func.func @transform_1(%arg0: i32) -> (i32, i32) {
    %c0_i32 = arith.constant 0 : i32
    %c0_i32_0 = arith.constant 0 : i32
    %c0_i32_1 = arith.constant 0 : i32
    return %c0_i32, %c0_i32_0 : i32, i32
  }
  func.func @transform_2(%arg0: i32) -> (i32, i32) {
    %c0_i32 = arith.constant 0 : i32
    %c0_i32_0 = arith.constant 0 : i32
    %c0_i32_1 = arith.constant 0 : i32
    return %c0_i32, %c0_i32_0 : i32, i32
  }
  func.func @transform_3(%arg0: i32) -> (i32, i32) {
    %c0_i32 = arith.constant 0 : i32
    %c0_i32_0 = arith.constant 0 : i32
    %c0_i32_1 = arith.constant 0 : i32
    return %c0_i32, %c0_i32_0 : i32, i32
  }
  func.func @transform_4(%arg0: i32) -> (i32, i32) {
    %c0_i32 = arith.constant 0 : i32
    %c0_i32_0 = arith.constant 0 : i32
    return %arg0, %c0_i32 : i32, i32
  }
  func.func @transform_5(%arg0: i32) -> (i32, i32) {
    %c0_i32 = arith.constant 0 : i32
    %c0_i32_0 = arith.constant 0 : i32
    return %arg0, %c0_i32 : i32, i32
  }
  func.func @transform_6(%arg0: i32) -> (i32, i32) {
    %c0_i32 = arith.constant 0 : i32
    %c0_i32_0 = arith.constant 0 : i32
    return %arg0, %c0_i32 : i32, i32
  }
}

</mosaic_0001>

<bundles_post_ra>
// kernel: tpu_custom_call.1
= control target key start
LH: loop header
LB: loop body
LE: loop exit
PB: predicated region body
PF: predicated region fallthrough
CT: control target
= control target key end

     0   :  { %12 = vsyncpa [#allocation3], 0  ;;  %s878_s0 = inlined_call_operand.vmem [shape: f32[64,8], index: 0, kind: input, shape index: {}]   ;;  %s879_s1 = inlined_call_operand.vmem [shape: bf16[8,128], index: 1, kind: input, shape index: {}]   ;;  %s880_s2 = inlined_call_operand.vmem [shape: f32[1,128], index: 2, kind: input, shape index: {}]   ;;  %s881_s3 = inlined_call_operand.vmem [shape: f32[1,128], index: 3, kind: input, shape index: {}]   ;;  %s882_s4 = inlined_call_operand.hbm [shape: bf16[64,128], index: 4, kind: output, shape index: {0}]   ;;  %s883_s5 = inlined_call_operand.vmem [shape: f32[64,1], index: 5, kind: output, shape index: {1}]   ;;  %s884_s6 = inlined_call_operand.vmem [shape: f32[64,1], index: 6, kind: output, shape index: {2}]  }
   0x1   :  { %14 = vsyncpa [#allocation3 + $0x1], 0  ;;  %s752_s21 = smov 0   ;;  %s754_s22 = smov 0  }
   0x2   :  { %s756_s23 = smov 0   ;;  %s758_s24 = smov 0  }
   0x3 LB: > { %s773_s25 = sadd.s32 4294967295, %s712_s24   ;;  %s559_s26 = sadd.s32 4294967294, %s712_s24   ;;  %s712_s24 = sphi %s758_s24, %s890_s24   ;;  %s708_s23 = sphi %s756_s23, %s889_s23   ;;  %s704_s22 = sphi %s754_s22, %s888_s22   ;;  %s700_s21 = sphi %s752_s21, %s887_s21  }
   0x4   : > { %s777_s27 = sadd.s32 1, %s712_s24   ;;  %s116_s28 = sadd.s32 1, %s708_s23 }
   0x5   : > { %s113_s29 = ssub.s32 %s712_s24, %s777_s27  ;;  %p126_p0 = scmp.ne.s32.totalorder %s708_s23, %s704_s22 }
   0x6   : > { %p114_p1 = scmp.eq.s32.totalorder %s113_s29, 0  ;;  %p127_p2 = scmp.eq.s32.totalorder %s773_s25, 1 }
   0x7   : > { %p132_p3 = scmp.ne.s32.totalorder %s704_s22, %s700_s21  ;;  %p133_p4 = scmp.eq.s32.totalorder %s559_s26, 1 }
   0x8   : > { %s788_s30 = scalar_select %p114_p1, %s708_s23, %s116_s28  }
   0x9   : > { %p790_p5 = por %p127_p2, %p126_p0  ;;  %p794_p6 = por %p133_p4, %p132_p3 }
   0xa   : > { %p562_p7 = scmp.ge.s32.totalorder %s712_s24, 1  ;;  %p221_p8 = scmp.lt.s32.totalorder %s712_s24, 3 }
   0xc   : > { %p222_p9 = pnand %p562_p7, %p221_p8 }
   0xd   : > { %v287_v0 = vld [vmem:[%s879_s1] sm:$0xf] (!%p222_p9)  ;;  %vm295_vm0 = vcmask (!%p222_p9), 1043456   ;;  %s564_s11 = sshll.u32 (!%p222_p9), %s773_s25, 2  ;;  %vm288_vm1 = vcmask (!%p222_p9), 64512   ;;  %s244_s16 = sand.u32 (!%p222_p9), 1, %s704_s22  }
   0xe   : > { %225 = sbr.rel (%p222_p9) target bundleno = 397 (0x18d), region = 36  ;;  %608 = vmatprep.subr.msk.bf16.mxu0 (!%p222_p9), %vm295_vm0, %v287_v0  ;;  %v297_v1 = vsel (!%p222_p9), %vm295_vm0, %v287_v0, 0  ;;  %p262_p10 = scmp.lt.s32.totalorder (!%p222_p9), %s564_s11, 7  ;;  %v577_v8 = vld [vmem:[%s881_s3] ss:$0 sm:$0xff] (!%p222_p9) }
   0xf   : > { %603 = vmatpush3.bf16.msra.mxu0 (!%p222_p9), %v297_v1  ;;  %v576_v9 = vld [vmem:[%s880_s2] ss:$0 sm:$0xff] (!%p222_p9)  ;;  %s563_s26 = sshll.u32 (!%p222_p9), %s244_s16, 4  ;;  %s587_s9 = sshll.u32 (!%p222_p9), %s773_s25, 8 }
  0x10   : > { %s246_s28 = scalar_lea.vmem (!%p222_p9), [#allocation2], %s563_s26  ;;  %s825_s13 = scalar_lea.hbm (!%p222_p9), %s882_s4, %s587_s9 }
  0x11   : > { %s439_s29 = sshll.u32 (!%p222_p9), %s246_s28, 4  ;;  %s829_s14 = scalar_lea.sflag (!%p222_p9), [#allocation3], %s244_s16  ;;  %s819_s29 = int_to_ptr.vmem [resolvable:$true] %s439_s29 }
  0x12   : > { %s714_s17 = smov (!%p222_p9), [#allocation2]  }
  0x13   : > { %s654_s18 = sshll.u32 (!%p222_p9), %s714_s17, 4  ;;  %s655_s18 = int_to_ptr.vmem [resolvable:$false] %s654_s18 }
  0x14   : > { %s656_s19 = scalar_lea.vmem (!%p222_p9), %s655_s18, 512  ;;  %p657_p0 = scmp.lt.s32.totalorder (!%p222_p9), %s819_s29, %s655_s18 }
  0x15   : > { %s892_s11 = smov (!%p262_p10, %s564_s11), 7 }
  0x16   : > { %s804_s12 = sshll.u32 %s892_s11, 3 }
  0x17   : > { %s265_s15 = scalar_lea.vmem %s878_s0, %s804_s12 }
  0x18   : > { %v281_v2 = vld [vmem:[%s265_s15] sm:$0xff]  ;;  %v282_v3 = vld [vmem:[%s265_s15 + $0x8] sm:$0xff]  ;;  %v283_v4 = vld [vmem:[%s265_s15 + $0x10] sm:$0xff] }
  0x19   : > { %v285_v5 = vpack.c.bf16 %v282_v3, %v281_v2  ;;  %v284_v6 = vld [vmem:[%s265_s15 + $0x18] sm:$0xff]  ;;  %s650_s15 = scalar_lea.vmem %s819_s29, 256 }
  0x1a   : > { %v286_v7 = vpack.c.bf16 %v284_v6, %v283_v4  ;;  %p651_p11 = scmp.ne.s32.totalorder %s819_s29, %s650_s15  ;;  %p658_p1 = scmp.lt.s32.totalorder %s656_s19, %s650_s15 }
  0x1b   : > { %604 = vmatprep.mubr.msk.bf16.mxu0 %vm288_vm1, %v285_v5 }
  0x1c   : > { %605 = vmatmul.mubr.msk.bf16.vlgmr.msra.gmra.mrb[0].mxu0 %vm288_vm1, %v286_v7  ;;  %p652_p12 = pnand %p651_p11, %p790_p5  ;;  %p659_p2 = por %p658_p1, %p657_p0 }
  0x1e   : > { %p653_p13 = pneg %p652_p12 }
  0x20   : > { %p660_p3 = pnand %p659_p2, %p653_p13 }
  0xef   : > { %v606_v10 = vpop.f32.mrb[0].mxu0 }
  0xf0   : > { %v333_v11 = vpop.f32.mrb[1].mxu0  ;;  %v401_v12 = vmul.f32 %v606_v10, %v577_v8  ;;  %v377_v13 = vmul.f32 %v606_v10, %v576_v9 }
  0xf1   : > { %v607_v14 = vpop.f32.mrb[2].mxu0  ;;  %v375_v19 = vmul.f32 %v576_v9, %v333_v11  ;;  %v399_v20 = vmul.f32 %v577_v8, %v333_v11 }
  0xf2   : > { %v596_v15 = vpack.c.bf16 %v607_v14, %v606_v10  ;;  %407 = vadd.xlane.f32.xlu1 %v401_v12  ;;  %383 = vadd.xlane.f32.xlu0 %v377_v13  ;;  %v336_v16 = vpop.f32.mrb[3].mxu0  ;;  %v378_v22 = vmul.f32 %v607_v14, %v576_v9  ;;  %v402_v23 = vmul.f32 %v607_v14, %v577_v8 }
  0xf3   : > { %v591_v17 = vpack.c.bf16 %v336_v16, %v333_v11  ;;  %v376_v18 = vmul.f32 %v576_v9, %v336_v16  ;;  %v400_v21 = vmul.f32 %v577_v8, %v336_v16 }
  0xf4   : > { %598 = vst [vmem:[%s246_s28 + $0x8] sm:$0xff] %v596_v15  }
  0xf5   : > { %592 = vst [vmem:[%s246_s28] sm:$0xff] %v591_v17  }
  0xf6   : > { %379 = vadd.xlane.f32.xlu0 %v375_v19  ;;  %381 = vadd.xlane.f32.xlu1 %v376_v18 }
  0xfa   : > { %403 = vadd.xlane.f32.xlu0 %v399_v20  ;;  %405 = vadd.xlane.f32.xlu1 %v400_v21 }
  0xfe   : > { %385 = vadd.xlane.f32.xlu0 %v378_v22  ;;  %409 = vadd.xlane.f32.xlu1 %v402_v23 }
  0xff   : > { %663 = shalt.err (!%p660_p3)
}
 0x100   : > { %s664_s25 = scalar_lea.hbm %s825_s13, 256  ;;  %s668_s26 = scalar_lea.hbm %s882_s4, 512 }
 0x101   : > { %p665_p4 = scmp.ne.s32.totalorder %s825_s13, %s664_s25  ;;  %p669_p9 = scmp.lt.u32.totalorder %s825_s13, %s882_s4 }
 0x102   : > { %p670_p10 = scmp.lt.u32.totalorder %s668_s26, %s664_s25  ;;  %p672_p12 = scmp.lt.u32.totalorder %s664_s25, %s825_s13 }
 0x103   : > { %p666_p7 = pnand %p665_p4, %p790_p5 }
 0x104   : > { %p671_p11 = por %p670_p10, %p669_p9 }
 0x105   : > { %p667_p8 = pneg %p666_p7 }
 0x106   : > { %p673_p13 = por %p672_p12, %p671_p11 }
 0x108   : > { %p674_p0 = pnand %p673_p13, %p667_p8 }
 0x10a   : > { %677 = shalt.err (!%p674_p0)
}
 0x10b   : > { %s715_s10 = smov 64   ;;  %s716_s11 = smov 4   ;;  %vm387_vm2 = vcmask 7168  }
 0x10c   : > { %609 = dma.vmem_to_hbm [thread:$0]  (%p790_p5), %s819_s29, 256, %s825_s13, %s829_s14, %s715_s10, %s715_s10, %s716_s11  }
 0x10d   : > { %s272_s18 = scalar_lea.vmem %s883_s5, %s804_s12  ;;  %s278_s16 = scalar_lea.vmem %s884_s6, %s804_s12 }
 0x17f   : > { %v408_v24 = vpop.xlane.xlu1 %407  ;;  %v384_v25 = vpop.xlane.xlu0 %383 }
 0x180   : > { %390 = vst.msk [vmem:[%s272_s18 + $0x10] sm:$0xff] %vm387_vm2, %v384_v25  ;;  %413 = vst.msk [vmem:[%s278_s16 + $0x10] sm:$0xff] %vm387_vm2, %v408_v24 }
 0x183   : > { %v380_v26 = vpop.xlane.xlu0 %379  ;;  %v382_v27 = vpop.xlane.xlu1 %381 }
 0x184   : > { %388 = vst.msk [vmem:[%s272_s18] sm:$0xff] %vm387_vm2, %v380_v26  ;;  %389 = vst.msk [vmem:[%s272_s18 + $0x8] sm:$0xff] %vm387_vm2, %v382_v27 }
 0x187   : > { %v404_v28 = vpop.xlane.xlu0 %403  ;;  %v406_v29 = vpop.xlane.xlu1 %405 }
 0x188   : > { %411 = vst.msk [vmem:[%s278_s16] sm:$0xff] %vm387_vm2, %v404_v28  ;;  %412 = vst.msk [vmem:[%s278_s16 + $0x8] sm:$0xff] %vm387_vm2, %v406_v29 }
 0x18b   : > { %v386_v30 = vpop.xlane.xlu0 %385  ;;  %v410_v31 = vpop.xlane.xlu1 %409 }
 0x18c   : > { %391 = vst.msk [vmem:[%s272_s18 + $0x18] sm:$0xff] %vm387_vm2, %v386_v30  ;;  %414 = vst.msk [vmem:[%s278_s16 + $0x18] sm:$0xff] %vm387_vm2, %v410_v31 }
 0x18d PF: > { %p615_p5 = scmp.ge.s32.totalorder %s712_s24, 2  ;;  %s462_s7 = sand.u32 1, %s700_s21  }
 0x18e   : > { %s463_s29 = scalar_lea.sflag [#allocation3], %s462_s7 }
 0x18f   : > { %p612_p1 = pnand %p615_p5, %p794_p6 }
 0x191   : > { %695 = dma.done.wait (!%p612_p1), %s463_s29, 256  }
 0x192   : > { %697 = vsyncadd (!%p612_p1), %s463_s29, 4294967040  ;;  %p17_p2 = scmp.ge.s32.totalorder %s777_s27, 4   ;;  %s887_s21 = smov %s704_s22 }
 0x193   : > { %s888_s22 = smov %s708_s23  ;;  %s889_s23 = smov %s788_s30 }
 0x194   : > { %s890_s24 = smov %s777_s27  ;;  %19 = sbr.rel (!%p17_p2) target bundleno = 3 (0x3), region = 95 }
 0x19b   :  { %484 = vsyncpa [#allocation3], 1 }
 0x19c   :  { %486 = vsyncpa [#allocation3 + $0x1], 1 }

</bundles_post_ra>
